<compile_context>
chip_gen: v7x
topology: tpu7x:2x2x1
jax: 0.10.0
libtpu: 0.0.40
codegen_flags: <defaults>
</compile_context>

<pallas_src>
import functools

import jax
import jax.numpy as jnp
from jax.experimental import pallas as pl
from jax.experimental.pallas import tpu as pltpu

BN_EPS = 1e-5
LANE = 128
SUBLANE = 8


def _round_up(a, b):
    return (a + b - 1) // b * b


@functools.lru_cache(maxsize=None)
def _vmem_budget_bytes():
    """3/4 of physical VMEM (48 MiB on v7x, 96 MiB on v5e/v6e); safe fallback otherwise."""
    try:
        cap = int(pltpu.get_tpu_info().vmem_capacity_bytes)
        return (cap * 3) // 4
    except Exception:
        return 48 * 1024 * 1024


# ---------------------------------------------------------------------------
# Fused kernel: phase 0 = Linear1 + batch stats (h kept resident in VMEM),
#               phase 1 = BN finalize (once) + FMA/ReLU + Linear2.
# ---------------------------------------------------------------------------
def _fused_kernel(x_ref, w1_ref, b1_ref, gamma_ref, beta_ref, w2_ref,
                  out_ref, h_sc, sum_sc, sumsq_sc, scale_sc, shift_sc,
                  *, n_valid, n_tile, mask_rows):
    phase = pl.program_id(0)
    i = pl.program_id(1)
    n_tiles = pl.num_programs(1)

    @pl.when(jnp.logical_and(phase == 0, i == 0))
    def _init():
        sum_sc[...] = jnp.zeros_like(sum_sc)
        sumsq_sc[...] = jnp.zeros_like(sumsq_sc)

    @pl.when(phase == 0)
    def _pass1():
        # bf16 x bf16 -> f32 accumulate on the MXU (x cast in-kernel from the f32 block).
        h = jnp.dot(x_ref[...].astype(jnp.bfloat16), w1_ref[...],
                    preferred_element_type=jnp.float32) + b1_ref[...]
        h_sc[i] = h.astype(h_sc.dtype)           # resident bf16 copy of this tile

        if mask_rows:
            # Only the last tile can contain padded rows: mask only there.
            @pl.when(i < n_tiles - 1)
            def _acc_full():
                sum_sc[...] += jnp.sum(h, axis=0, keepdims=True)
                sumsq_sc[...] += jnp.sum(h * h, axis=0, keepdims=True)

            @pl.when(i == n_tiles - 1)
            def _acc_masked():
                rows = jax.lax.broadcasted_iota(jnp.int32, h.shape, 0) + i * n_tile
                hm = jnp.where(rows < n_valid, h, 0.0)
                sum_sc[...] += jnp.sum(hm, axis=0, keepdims=True)
                sumsq_sc[...] += jnp.sum(hm * hm, axis=0, keepdims=True)
        else:
            sum_sc[...] += jnp.sum(h, axis=0, keepdims=True)
            sumsq_sc[...] += jnp.sum(h * h, axis=0, keepdims=True)

    @pl.when(jnp.logical_and(phase == 1, i == 0))
    def _finalize_bn():
        inv_n = jnp.float32(1.0 / n_valid)
        mean = sum_sc[...] * inv_n
        var = jnp.maximum(sumsq_sc[...] * inv_n - mean * mean, 0.0)
        scale = gamma_ref[...] * jax.lax.rsqrt(var + BN_EPS)
        scale_sc[...] = scale
        shift_sc[...] = beta_ref[...] - mean * scale

    @pl.when(phase == 1)
    def _pass2():
        h = h_sc[i].astype(jnp.float32)
        h = jnp.maximum(h * scale_sc[...] + shift_sc[...], 0.0)   # FMA + ReLU (f32)
        out = jnp.dot(h.astype(jnp.bfloat16), w2_ref[...],
                      preferred_element_type=jnp.float32)
        out_ref[...] = out.astype(out_ref.dtype)


# ---------------------------------------------------------------------------
# Two-pass fallback, pass 1: Linear1 + batch stats, h stored to HBM in bf16,
# BN scale/shift finalized on the last grid step.
# ---------------------------------------------------------------------------
def _linear_stats_kernel(x_ref, w1_ref, b1_ref, gamma_ref, beta_ref,
                         h_ref, scale_ref, shift_ref, sum_sc, sumsq_sc,
                         *, n_valid, n_tile, mask_rows):
    i = pl.program_id(0)
    n_tiles = pl.num_programs(0)

    @pl.when(i == 0)
    def _init():
        sum_sc[...] = jnp.zeros_like(sum_sc)
        sumsq_sc[...] = jnp.zeros_like(sumsq_sc)

    h = jnp.dot(x_ref[...].astype(jnp.bfloat16), w1_ref[...],
                preferred_element_type=jnp.float32) + b1_ref[...]
    h_ref[...] = h.astype(h_ref.dtype)            # bf16 writeback (half the old bytes)

    if mask_rows:
        @pl.when(i < n_tiles - 1)
        def _acc_full():
            sum_sc[...] += jnp.sum(h, axis=0, keepdims=True)
            sumsq_sc[...] += jnp.sum(h * h, axis=0, keepdims=True)

        @pl.when(i == n_tiles - 1)
        def _acc_masked():
            rows = jax.lax.broadcasted_iota(jnp.int32, h.shape, 0) + i * n_tile
            hm = jnp.where(rows < n_valid, h, 0.0)
            sum_sc[...] += jnp.sum(hm, axis=0, keepdims=True)
            sumsq_sc[...] += jnp.sum(hm * hm, axis=0, keepdims=True)
    else:
        sum_sc[...] += jnp.sum(h, axis=0, keepdims=True)
        sumsq_sc[...] += jnp.sum(h * h, axis=0, keepdims=True)

    @pl.when(i == n_tiles - 1)
    def _finalize_bn():
        inv_n = jnp.float32(1.0 / n_valid)
        mean = sum_sc[...] * inv_n
        var = jnp.maximum(sumsq_sc[...] * inv_n - mean * mean, 0.0)
        scale = gamma_ref[...] * jax.lax.rsqrt(var + BN_EPS)
        scale_ref[...] = scale
        shift_ref[...] = beta_ref[...] - mean * scale


# ---------------------------------------------------------------------------
# Two-pass fallback, pass 2: per N tile FMA + ReLU + Linear2 (no bias).
# ---------------------------------------------------------------------------
def _bn_relu_linear_kernel(h_ref, scale_ref, shift_ref, w2_ref, out_ref):
    h = h_ref[...].astype(jnp.float32)
    h = jnp.maximum(h * scale_ref[...] + shift_ref[...], 0.0)
    out = jnp.dot(h.astype(jnp.bfloat16), w2_ref[...],
                  preferred_element_type=jnp.float32)
    out_ref[...] = out.astype(out_ref.dtype)


# ---------------------------------------------------------------------------
# Parameter preparation (hoist padding + bf16 casts out of the per-call path).
# ---------------------------------------------------------------------------
def prepare_params(w1_t, b1, gamma, beta, w2_t):
    """Pad feature dims to lane multiples and cast weights to bf16 once.

    w1_t: [in_dim, hidden]; w2_t: [hidden, out_dim] (pre-transposed vs PyTorch [out, in]).
    Returns (params_tuple, out_dim).
    """
    in_dim, hid_dim = w1_t.shape
    out_dim = w2_t.shape[1]
    in_p = _round_up(in_dim, LANE)
    hid_p = _round_up(hid_dim, LANE)
    out_p = _round_up(out_dim, LANE)

    def pad2(a, rows, cols, dtype):
        a = jnp.asarray(a, dtype)
        return jnp.pad(a, ((0, rows - a.shape[0]), (0, cols - a.shape[1])))

    w1_p = pad2(w1_t, in_p, hid_p, jnp.bfloat16)
    w2_p = pad2(w2_t, hid_p, out_p, jnp.bfloat16)
    b1_p = pad2(jnp.reshape(b1, (1, -1)), 1, hid_p, jnp.float32)
    g_p = pad2(jnp.reshape(gamma, (1, -1)), 1, hid_p, jnp.float32)
    be_p = pad2(jnp.reshape(beta, (1, -1)), 1, hid_p, jnp.float32)
    return (w1_p, b1_p, g_p, be_p, w2_p), out_dim


# ---------------------------------------------------------------------------
# Main entry point.
# ---------------------------------------------------------------------------
@functools.partial(jax.jit,
                   static_argnames=("out_dim", "n_tile", "force_two_pass", "out_dtype"))
def byol_neck_apply(x, params, *, out_dim, n_tile=512, force_two_pass=False,
                    out_dtype=jnp.float32):
    """x: [N, in_dim] float32. params from prepare_params(). Returns [N, out_dim]."""
    w1_p, b1_p, g_p, be_p, w2_p = params
    n, in_dim = x.shape
    in_p, hid_p = w1_p.shape
    out_p = w2_p.shape[1]

    tn = min(n_tile, _round_up(n, SUBLANE))
    n_p = _round_up(n, tn)
    n_tiles = n_p // tn
    mask_rows = (n_p != n)

    x_p = x.astype(jnp.float32)
    if (n_p, in_p) != (n, in_dim):
        x_p = jnp.pad(x_p, ((0, n_p - n), (0, in_p - in_dim)))

    vmem_limit = _vmem_budget_bytes()

    # Conservative VMEM estimate for the fused path (assume all pipelined blocks,
    # including the resident weights, are double-buffered by the pipeliner).
    fused_bytes = (
        2 * tn * in_p * 4            # x tile (f32, double buffered)
        + 2 * tn * out_p * 4         # out tile (double buffered)
        + 2 * in_p * hid_p * 2       # W1 (bf16)
        + 2 * hid_p * out_p * 2      # W2 (bf16)
        + 2 * 3 * hid_p * 4          # b1 / gamma / beta
        + n_tiles * tn * hid_p * 2   # resident h scratch (bf16)
        + 4 * hid_p * 4              # sum / sumsq / scale / shift scratch
    )
    use_fused = (not force_two_pass) and (fused_bytes <= vmem_limit - (4 << 20))

    def cparams(sem):
        return pltpu.CompilerParams(dimension_semantics=sem,
                                    vmem_limit_bytes=vmem_limit)

    if use_fused:
        # Single kernel; h never touches HBM.  Phase axis p: 0 = Linear1+stats, 1 = BN+ReLU+Linear2.
        # x is only needed in phase 0 (index pinned to tile 0 in phase 1 -> no re-read);
        # the output block index is pinned to 0 in phase 0 so no garbage writeback occurs.
        z_p = pl.pallas_call(
            functools.partial(_fused_kernel, n_valid=n, n_tile=tn, mask_rows=mask_rows),
            grid=(2, n_tiles),
            in_specs=[
                pl.BlockSpec((tn, in_p), lambda p, i: (i * (1 - p), 0)),   # x tile
                pl.BlockSpec((in_p, hid_p), lambda p, i: (0, 0)),          # W1 resident
                pl.BlockSpec((1, hid_p), lambda p, i: (0, 0)),             # b1
                pl.BlockSpec((1, hid_p), lambda p, i: (0, 0)),             # gamma
                pl.BlockSpec((1, hid_p), lambda p, i: (0, 0)),             # beta
                pl.BlockSpec((hid_p, out_p), lambda p, i: (0, 0)),         # W2 resident
            ],
            out_specs=pl.BlockSpec((tn, out_p), lambda p, i: (i * p, 0)),  # lane-dense out
            out_shape=jax.ShapeDtypeStruct((n_p, out_p), out_dtype),
            scratch_shapes=[
                pltpu.VMEM((n_tiles, tn, hid_p), jnp.bfloat16),  # resident h
                pltpu.VMEM((1, hid_p), jnp.float32),             # sum
                pltpu.VMEM((1, hid_p), jnp.float32),             # sumsq
                pltpu.VMEM((1, hid_p), jnp.float32),             # scale
                pltpu.VMEM((1, hid_p), jnp.float32),             # shift
            ],
            compiler_params=cparams(("arbitrary", "arbitrary")),
        )(x_p, w1_p, b1_p, g_p, be_p, w2_p)
    else:
        # Pass 1: Linear1 + batch stats; h stored in bf16; scale/shift finalized once.
        h, scale, shift = pl.pallas_call(
            functools.partial(_linear_stats_kernel, n_valid=n, n_tile=tn,
                              mask_rows=mask_rows),
            grid=(n_tiles,),
            in_specs=[
                pl.BlockSpec((tn, in_p), lambda i: (i, 0)),        # x tile (pipelined)
                pl.BlockSpec((in_p, hid_p), lambda i: (0, 0)),     # W1 resident
                pl.BlockSpec((1, hid_p), lambda i: (0, 0)),        # b1
                pl.BlockSpec((1, hid_p), lambda i: (0, 0)),        # gamma
                pl.BlockSpec((1, hid_p), lambda i: (0, 0)),        # beta
            ],
            out_specs=(
                pl.BlockSpec((tn, hid_p), lambda i: (i, 0)),       # h (bf16)
                pl.BlockSpec((1, hid_p), lambda i: (0, 0)),        # scale
                pl.BlockSpec((1, hid_p), lambda i: (0, 0)),        # shift
            ),
            out_shape=(
                jax.ShapeDtypeStruct((n_p, hid_p), jnp.bfloat16),
                jax.ShapeDtypeStruct((1, hid_p), jnp.float32),
                jax.ShapeDtypeStruct((1, hid_p), jnp.float32),
            ),
            scratch_shapes=[pltpu.VMEM((1, hid_p), jnp.float32),   # sum
                            pltpu.VMEM((1, hid_p), jnp.float32)],  # sumsq
            compiler_params=cparams(("arbitrary",)),
        )(x_p, w1_p, b1_p, g_p, be_p)

        # Pass 2: FMA + ReLU + Linear2 per N tile (independent tiles).
        z_p = pl.pallas_call(
            _bn_relu_linear_kernel,
            grid=(n_tiles,),
            in_specs=[
                pl.BlockSpec((tn, hid_p), lambda i: (i, 0)),       # h tile (pipelined)
                pl.BlockSpec((1, hid_p), lambda i: (0, 0)),        # scale
                pl.BlockSpec((1, hid_p), lambda i: (0, 0)),        # shift
                pl.BlockSpec((hid_p, out_p), lambda i: (0, 0)),    # W2 resident
            ],
            out_specs=pl.BlockSpec((tn, out_p), lambda i: (i, 0)),
            out_shape=jax.ShapeDtypeStruct((n_p, out_p), out_dtype),
            compiler_params=cparams(("parallel",)),
        )(h, scale, shift, w2_p)

    return z_p[:n, :out_dim]


def byol_neck(x, w1_t, b1, gamma, beta, w2_t, *, n_tile=512, force_two_pass=False,
              out_dtype=jnp.float32):
    """Convenience wrapper.  In production call prepare_params() once and reuse."""
    params, out_dim = prepare_params(w1_t, b1, gamma, beta, w2_t)
    return byol_neck_apply(x, params, out_dim=out_dim, n_tile=n_tile,
                           force_two_pass=force_two_pass, out_dtype=out_dtype)


# ---------------------------------------------------------------------------
# References.
# ---------------------------------------------------------------------------
def byol_neck_ref_f32(x, w1_t, b1, gamma, beta, w2_t):
    """Pure-f32 reference (module semantics, BatchNorm1d training mode)."""
    h = x @ w1_t + b1[None, :]
    mean = jnp.mean(h, axis=0, keepdims=True)
    var = jnp.mean((h - mean) ** 2, axis=0, keepdims=True)
    h = (h - mean) * jax.lax.rsqrt(var + BN_EPS) * gamma[None, :] + beta[None, :]
    return jnp.maximum(h, 0.0) @ w2_t


def byol_neck_ref_mixed(x, w1_t, b1, gamma, beta, w2_t):
    """Reference mirroring the kernel's precision policy (bf16 matmuls, bf16 h, f32 elsewhere)."""
    n = x.shape[0]
    h = jnp.dot(x.astype(jnp.bfloat16), w1_t.astype(jnp.bfloat16),
                preferred_element_type=jnp.float32) + b1[None, :]
    mean = jnp.sum(h, axis=0, keepdims=True) / n
    var = jnp.maximum(jnp.sum(h * h, axis=0, keepdims=True) / n - mean * mean, 0.0)
    scale = gamma[None, :] * jax.lax.rsqrt(var + BN_EPS)
    shift = beta[None, :] - mean * scale
    h_q = h.astype(jnp.bfloat16).astype(jnp.float32)     # kernel keeps/stores h in bf16
    a = jnp.maximum(h_q * scale + shift, 0.0)
    return jnp.dot(a.astype(jnp.bfloat16), w2_t.astype(jnp.bfloat16),
                   preferred_element_type=jnp.float32)


if __name__ == "__main__":
    # Small config consistent with the module: input_dim=32, hidden_dim=64, output_dim=16.
    N, INPUT_DIM, HIDDEN_DIM, OUTPUT_DIM = 8, 32, 64, 16

    key = jax.random.PRNGKey(0)
    kx, kw1, kb1, kw2 = jax.random.split(key, 4)

    x = jax.random.normal(kx, (N, INPUT_DIM), dtype=jnp.float32)

    # PyTorch-style uniform fan-in init; Linear weights pre-transposed to [in, out].
    bound1 = 1.0 / (INPUT_DIM ** 0.5)
    w1_t = jax.random.uniform(kw1, (INPUT_DIM, HIDDEN_DIM), jnp.float32, -bound1, bound1)
    b1 = jax.random.uniform(kb1, (HIDDEN_DIM,), jnp.float32, -bound1, bound1)
    gamma = jnp.ones((HIDDEN_DIM,), jnp.float32)    # BatchNorm1d weight init
    beta = jnp.zeros((HIDDEN_DIM,), jnp.float32)    # BatchNorm1d bias init
    bound2 = 1.0 / (HIDDEN_DIM ** 0.5)
    w2_t = jax.random.uniform(kw2, (HIDDEN_DIM, OUTPUT_DIM), jnp.float32, -bound2, bound2)

    # Exercise both code paths: the fused (h-resident-in-VMEM) default and the
    # two-pass (bf16 h through HBM) fallback.
    z_fused = byol_neck(x, w1_t, b1, gamma, beta, w2_t)
    z_two = byol_neck(x, w1_t, b1, gamma, beta, w2_t, force_two_pass=True)
    jax.block_until_ready((z_fused, z_two))
    assert z_fused.shape == (N, OUTPUT_DIM)
    assert z_two.shape == (N, OUTPUT_DIM)

    z_mixed = byol_neck_ref_mixed(x, w1_t, b1, gamma, beta, w2_t)
    z_f32 = byol_neck_ref_f32(x, w1_t, b1, gamma, beta, w2_t)
    for name, z in (("fused", z_fused), ("two_pass", z_two)):
        # Tight check vs a reference using the same mixed-precision policy.
        assert jnp.allclose(z, z_mixed, atol=2e-3, rtol=2e-3), f"{name}: mismatch vs mixed ref"
        # Looser check vs the pure-f32 module semantics (bf16 quantization only).
        assert jnp.allclose(z, z_f32, atol=5e-2, rtol=5e-2), f"{name}: mismatch vs f32 ref"

    print("KERNEL_OK")
</pallas_src>

<mosaic_0001>
module attributes {stable_mosaic.version = 11 : i64} {
  func.func @_fused_kernel(%arg0: i32, %arg1: i32, %arg2: memref<8x128xf32, #tpu.memory_space<vmem>>, %arg3: memref<128x128xbf16, #tpu.memory_space<vmem>>, %arg4: memref<1x128xf32, #tpu.memory_space<vmem>>, %arg5: memref<1x128xf32, #tpu.memory_space<vmem>>, %arg6: memref<1x128xf32, #tpu.memory_space<vmem>>, %arg7: memref<128x128xbf16, #tpu.memory_space<vmem>>, %arg8: memref<8x128xf32, #tpu.memory_space<vmem>>, %arg9: memref<1x8x128xbf16, #tpu.memory_space<vmem>>, %arg10: memref<1x128xf32, #tpu.memory_space<vmem>>, %arg11: memref<1x128xf32, #tpu.memory_space<vmem>>, %arg12: memref<1x128xf32, #tpu.memory_space<vmem>>, %arg13: memref<1x128xf32, #tpu.memory_space<vmem>>) attributes {dimension_semantics = [#tpu.dimension_semantics<arbitrary>, #tpu.dimension_semantics<arbitrary>], iteration_bounds = array<i64: 2, 1>, scalar_prefetch = 0 : i64, scratch_operands = 5 : i64, tpu.core_type = #tpu.core_type<tc>, window_params = [{transform_indices = @transform_0, window_bounds = array<i64: 8, 128>}, {pipeline_mode = #tpu.pipeline_mode<synchronous>, transform_indices = @transform_1, window_bounds = array<i64: 128, 128>}, {pipeline_mode = #tpu.pipeline_mode<synchronous>, transform_indices = @transform_2, window_bounds = array<i64: 1, 128>}, {pipeline_mode = #tpu.pipeline_mode<synchronous>, transform_indices = @transform_3, window_bounds = array<i64: 1, 128>}, {pipeline_mode = #tpu.pipeline_mode<synchronous>, transform_indices = @transform_4, window_bounds = array<i64: 1, 128>}, {pipeline_mode = #tpu.pipeline_mode<synchronous>, transform_indices = @transform_5, window_bounds = array<i64: 128, 128>}, {transform_indices = @transform_6, window_bounds = array<i64: 8, 128>}]} {
    %c0_i32 = arith.constant 0 : i32
    %0 = arith.cmpi eq, %arg0, %c0_i32 : i32
    %c0_i32_0 = arith.constant 0 : i32
    %1 = arith.cmpi eq, %arg1, %c0_i32_0 : i32
    %2 = arith.andi %0, %1 : i1
    %3 = arith.extui %2 : i1 to i32
    %c0_i32_1 = arith.constant 0 : i32
    %4 = arith.cmpi ne, %3, %c0_i32_1 : i32
    scf.if %4 {
      %cst = arith.constant 0.000000e+00 : f32
      %16 = vector.broadcast %cst : f32 to vector<1x128xf32>
      %c0 = arith.constant 0 : index
      %c0_8 = arith.constant 0 : index
      %17 = vector.load %arg10[%c0, %c0_8] : memref<1x128xf32, #tpu.memory_space<vmem>>, vector<1x128xf32>
      tpu.vector_store %arg10[%c0, %c0_8], %16 {strides = array<i32>} : memref<1x128xf32, #tpu.memory_space<vmem>>, vector<1x128xf32>,
      %cst_9 = arith.constant 0.000000e+00 : f32
      %18 = vector.broadcast %cst_9 : f32 to vector<1x128xf32>
      %c0_10 = arith.constant 0 : index
      %c0_11 = arith.constant 0 : index
      %19 = vector.load %arg11[%c0_10, %c0_11] : memref<1x128xf32, #tpu.memory_space<vmem>>, vector<1x128xf32>
      tpu.vector_store %arg11[%c0_10, %c0_11], %18 {strides = array<i32>} : memref<1x128xf32, #tpu.memory_space<vmem>>, vector<1x128xf32>,
    } else {
    }
    %c0_i32_2 = arith.constant 0 : i32
    %5 = arith.cmpi eq, %arg0, %c0_i32_2 : i32
    %6 = arith.extui %5 : i1 to i32
    %c0_i32_3 = arith.constant 0 : i32
    %7 = arith.cmpi ne, %6, %c0_i32_3 : i32
    scf.if %7 {
      %c0 = arith.constant 0 : index
      %c0_8 = arith.constant 0 : index
      %16 = vector.load %arg2[%c0, %c0_8] : memref<8x128xf32, #tpu.memory_space<vmem>>, vector<8x128xf32>
      %17 = arith.truncf %16 : vector<8x128xf32> to vector<8x128xbf16>
      %c0_9 = arith.constant 0 : index
      %c0_10 = arith.constant 0 : index
      %18 = vector.load %arg3[%c0_9, %c0_10] : memref<128x128xbf16, #tpu.memory_space<vmem>>, vector<128x128xbf16>
      %cst = arith.constant dense<0.000000e+00> : vector<8x128xf32>
      %19 = tpu.matmul %17, %18, %cst {dimension_numbers = #tpu.dot_dimension_numbers<[1], [0], [0], [1], [0, 0, 1, 1], [], []>} : vector<8x128xbf16>, vector<128x128xbf16>, vector<8x128xf32> -> vector<8x128xf32>
      %c0_11 = arith.constant 0 : index
      %c0_12 = arith.constant 0 : index
      %20 = vector.load %arg4[%c0_11, %c0_12] : memref<1x128xf32, #tpu.memory_space<vmem>>, vector<1x128xf32>
      %21 = vector.broadcast %20 : vector<1x128xf32> to vector<8x128xf32>
      %22 = arith.addf %19, %21 : vector<8x128xf32>
      %23 = arith.truncf %22 : vector<8x128xf32> to vector<8x128xbf16>
      %24 = arith.index_cast %arg1 : i32 to index
      %c0_13 = arith.constant 0 : index
      %c0_14 = arith.constant 0 : index
      %25 = vector.load %arg9[%24, %c0_13, %c0_14] : memref<1x8x128xbf16, #tpu.memory_space<vmem>>, vector<1x8x128xbf16>
      %26 = vector.shape_cast %25 : vector<1x8x128xbf16> to vector<8x128xbf16>
      %27 = vector.shape_cast %23 : vector<8x128xbf16> to vector<1x8x128xbf16>
      tpu.vector_store %arg9[%24, %c0_13, %c0_14], %27 {strides = array<i32>} : memref<1x8x128xbf16, #tpu.memory_space<vmem>>, vector<1x8x128xbf16>,
      %c0_15 = arith.constant 0 : index
      %c0_16 = arith.constant 0 : index
      %28 = vector.load %arg10[%c0_15, %c0_16] : memref<1x128xf32, #tpu.memory_space<vmem>>, vector<1x128xf32>
      %cst_17 = arith.constant dense<0.000000e+00> : vector<128xf32>
      %29 = vector.multi_reduction <add>, %22, %cst_17 [0] : vector<8x128xf32> to vector<128xf32>
      %30 = vector.shape_cast %29 : vector<128xf32> to vector<1x128xf32>
      %31 = arith.addf %28, %30 : vector<1x128xf32>
      %c0_18 = arith.constant 0 : index
      %c0_19 = arith.constant 0 : index
      %32 = vector.load %arg10[%c0_18, %c0_19] : memref<1x128xf32, #tpu.memory_space<vmem>>, vector<1x128xf32>
      tpu.vector_store %arg10[%c0_18, %c0_19], %31 {strides = array<i32>} : memref<1x128xf32, #tpu.memory_space<vmem>>, vector<1x128xf32>,
      %c0_20 = arith.constant 0 : index
      %c0_21 = arith.constant 0 : index
      %33 = vector.load %arg11[%c0_20, %c0_21] : memref<1x128xf32, #tpu.memory_space<vmem>>, vector<1x128xf32>
      %34 = arith.mulf %22, %22 : vector<8x128xf32>
      %cst_22 = arith.constant dense<0.000000e+00> : vector<128xf32>
      %35 = vector.multi_reduction <add>, %34, %cst_22 [0] : vector<8x128xf32> to vector<128xf32>
      %36 = vector.shape_cast %35 : vector<128xf32> to vector<1x128xf32>
      %37 = arith.addf %33, %36 : vector<1x128xf32>
      %c0_23 = arith.constant 0 : index
      %c0_24 = arith.constant 0 : index
      %38 = vector.load %arg11[%c0_23, %c0_24] : memref<1x128xf32, #tpu.memory_space<vmem>>, vector<1x128xf32>
      tpu.vector_store %arg11[%c0_23, %c0_24], %37 {strides = array<i32>} : memref<1x128xf32, #tpu.memory_space<vmem>>, vector<1x128xf32>,
    } else {
    }
    %c1_i32 = arith.constant 1 : i32
    %8 = arith.cmpi eq, %arg0, %c1_i32 : i32
    %c0_i32_4 = arith.constant 0 : i32
    %9 = arith.cmpi eq, %arg1, %c0_i32_4 : i32
    %10 = arith.andi %8, %9 : i1
    %11 = arith.extui %10 : i1 to i32
    %c0_i32_5 = arith.constant 0 : i32
    %12 = arith.cmpi ne, %11, %c0_i32_5 : i32
    scf.if %12 {
      %c0 = arith.constant 0 : index
      %c0_8 = arith.constant 0 : index
      %16 = vector.load %arg10[%c0, %c0_8] : memref<1x128xf32, #tpu.memory_space<vmem>>, vector<1x128xf32>
      %cst = arith.constant 1.250000e-01 : f32
      %17 = vector.broadcast %cst : f32 to vector<1x128xf32>
      %18 = arith.mulf %16, %17 : vector<1x128xf32>
      %c0_9 = arith.constant 0 : index
      %c0_10 = arith.constant 0 : index
      %19 = vector.load %arg11[%c0_9, %c0_10] : memref<1x128xf32, #tpu.memory_space<vmem>>, vector<1x128xf32>
      %cst_11 = arith.constant 1.250000e-01 : f32
      %20 = vector.broadcast %cst_11 : f32 to vector<1x128xf32>
      %21 = arith.mulf %19, %20 : vector<1x128xf32>
      %22 = arith.mulf %18, %18 : vector<1x128xf32>
      %23 = arith.subf %21, %22 : vector<1x128xf32>
      %cst_12 = arith.constant 0.000000e+00 : f32
      %24 = vector.broadcast %cst_12 : f32 to vector<1x128xf32>
      %25 = arith.maximumf %23, %24 : vector<1x128xf32>
      %c0_13 = arith.constant 0 : index
      %c0_14 = arith.constant 0 : index
      %26 = vector.load %arg5[%c0_13, %c0_14] : memref<1x128xf32, #tpu.memory_space<vmem>>, vector<1x128xf32>
      %cst_15 = arith.constant 9.99999974E-6 : f32
      %27 = vector.broadcast %cst_15 : f32 to vector<1x128xf32>
      %28 = arith.addf %25, %27 : vector<1x128xf32>
      %29 = math.rsqrt %28 : vector<1x128xf32>
      %30 = arith.mulf %26, %29 : vector<1x128xf32>
      %c0_16 = arith.constant 0 : index
      %c0_17 = arith.constant 0 : index
      %31 = vector.load %arg12[%c0_16, %c0_17] : memref<1x128xf32, #tpu.memory_space<vmem>>, vector<1x128xf32>
      tpu.vector_store %arg12[%c0_16, %c0_17], %30 {strides = array<i32>} : memref<1x128xf32, #tpu.memory_space<vmem>>, vector<1x128xf32>,
      %c0_18 = arith.constant 0 : index
      %c0_19 = arith.constant 0 : index
      %32 = vector.load %arg6[%c0_18, %c0_19] : memref<1x128xf32, #tpu.memory_space<vmem>>, vector<1x128xf32>
      %33 = arith.mulf %18, %30 : vector<1x128xf32>
      %34 = arith.subf %32, %33 : vector<1x128xf32>
      %c0_20 = arith.constant 0 : index
      %c0_21 = arith.constant 0 : index
      %35 = vector.load %arg13[%c0_20, %c0_21] : memref<1x128xf32, #tpu.memory_space<vmem>>, vector<1x128xf32>
      tpu.vector_store %arg13[%c0_20, %c0_21], %34 {strides = array<i32>} : memref<1x128xf32, #tpu.memory_space<vmem>>, vector<1x128xf32>,
    } else {
    }
    %c1_i32_6 = arith.constant 1 : i32
    %13 = arith.cmpi eq, %arg0, %c1_i32_6 : i32
    %14 = arith.extui %13 : i1 to i32
    %c0_i32_7 = arith.constant 0 : i32
    %15 = arith.cmpi ne, %14, %c0_i32_7 : i32
    scf.if %15 {
      %16 = arith.index_cast %arg1 : i32 to index
      %c0 = arith.constant 0 : index
      %c0_8 = arith.constant 0 : index
      %17 = vector.load %arg9[%16, %c0, %c0_8] : memref<1x8x128xbf16, #tpu.memory_space<vmem>>, vector<1x8x128xbf16>
      %18 = vector.shape_cast %17 : vector<1x8x128xbf16> to vector<8x128xbf16>
      %19 = arith.extf %18 : vector<8x128xbf16> to vector<8x128xf32>
      %c0_9 = arith.constant 0 : index
      %c0_10 = arith.constant 0 : index
      %20 = vector.load %arg12[%c0_9, %c0_10] : memref<1x128xf32, #tpu.memory_space<vmem>>, vector<1x128xf32>
      %21 = vector.broadcast %20 : vector<1x128xf32> to vector<8x128xf32>
      %22 = arith.mulf %19, %21 : vector<8x128xf32>
      %c0_11 = arith.constant 0 : index
      %c0_12 = arith.constant 0 : index
      %23 = vector.load %arg13[%c0_11, %c0_12] : memref<1x128xf32, #tpu.memory_space<vmem>>, vector<1x128xf32>
      %24 = vector.broadcast %23 : vector<1x128xf32> to vector<8x128xf32>
      %25 = arith.addf %22, %24 : vector<8x128xf32>
      %cst = arith.constant 0.000000e+00 : f32
      %26 = vector.broadcast %cst : f32 to vector<8x128xf32>
      %27 = arith.maximumf %25, %26 : vector<8x128xf32>
      %28 = arith.truncf %27 : vector<8x128xf32> to vector<8x128xbf16>
      %c0_13 = arith.constant 0 : index
      %c0_14 = arith.constant 0 : index
      %29 = vector.load %arg7[%c0_13, %c0_14] : memref<128x128xbf16, #tpu.memory_space<vmem>>, vector<128x128xbf16>
      %cst_15 = arith.constant dense<0.000000e+00> : vector<8x128xf32>
      %30 = tpu.matmul %28, %29, %cst_15 {dimension_numbers = #tpu.dot_dimension_numbers<[1], [0], [0], [1], [0, 0, 1, 1], [], []>} : vector<8x128xbf16>, vector<128x128xbf16>, vector<8x128xf32> -> vector<8x128xf32>
      %c0_16 = arith.constant 0 : index
      %c0_17 = arith.constant 0 : index
      %31 = vector.load %arg8[%c0_16, %c0_17] : memref<8x128xf32, #tpu.memory_space<vmem>>, vector<8x128xf32>
      tpu.vector_store %arg8[%c0_16, %c0_17], %30 {strides = array<i32>} : memref<8x128xf32, #tpu.memory_space<vmem>>, vector<8x128xf32>,
    } else {
    }
    return
  }
  func.func @transform_0(%arg0: i32, %arg1: i32) -> (i32, i32) {
    %c1_i32 = arith.constant 1 : i32
    %0 = arith.subi %c1_i32, %arg0 : i32
    %1 = arith.muli %arg1, %0 : i32
    %c0_i32 = arith.constant 0 : i32
    %c0_i32_0 = arith.constant 0 : i32
    return %1, %c0_i32 : i32, i32
  }
  func.func @transform_1(%arg0: i32, %arg1: i32) -> (i32, i32) {
    %c0_i32 = arith.constant 0 : i32
    %c0_i32_0 = arith.constant 0 : i32
    %c0_i32_1 = arith.constant 0 : i32
    return %c0_i32, %c0_i32_0 : i32, i32
  }
  func.func @transform_2(%arg0: i32, %arg1: i32) -> (i32, i32) {
    %c0_i32 = arith.constant 0 : i32
    %c0_i32_0 = arith.constant 0 : i32
    %c0_i32_1 = arith.constant 0 : i32
    return %c0_i32, %c0_i32_0 : i32, i32
  }
  func.func @transform_3(%arg0: i32, %arg1: i32) -> (i32, i32) {
    %c0_i32 = arith.constant 0 : i32
    %c0_i32_0 = arith.constant 0 : i32
    %c0_i32_1 = arith.constant 0 : i32
    return %c0_i32, %c0_i32_0 : i32, i32
  }
  func.func @transform_4(%arg0: i32, %arg1: i32) -> (i32, i32) {
    %c0_i32 = arith.constant 0 : i32
    %c0_i32_0 = arith.constant 0 : i32
    %c0_i32_1 = arith.constant 0 : i32
    return %c0_i32, %c0_i32_0 : i32, i32
  }
  func.func @transform_5(%arg0: i32, %arg1: i32) -> (i32, i32) {
    %c0_i32 = arith.constant 0 : i32
    %c0_i32_0 = arith.constant 0 : i32
    %c0_i32_1 = arith.constant 0 : i32
    return %c0_i32, %c0_i32_0 : i32, i32
  }
  func.func @transform_6(%arg0: i32, %arg1: i32) -> (i32, i32) {
    %0 = arith.muli %arg1, %arg0 : i32
    %c0_i32 = arith.constant 0 : i32
    %c0_i32_0 = arith.constant 0 : i32
    return %0, %c0_i32 : i32, i32
  }
}

</mosaic_0001>

<bundles_post_ra>
// kernel: byol_neck_apply.1
= control target key start
LH: loop header
LB: loop body
LE: loop exit
PB: predicated region body
PF: predicated region fallthrough
CT: control target
= control target key end

     0   :  { %11 = vsyncpa [#allocation8], 0  ;;  %s1206_s0 = inlined_call_operand.vmem [shape: f32[8,128], index: 0, kind: input, shape index: {}]   ;;  %s1207_s1 = inlined_call_operand.hbm [shape: bf16[128,128], index: 1, kind: input, shape index: {}]   ;;  %s1208_s2 = inlined_call_operand.vmem [shape: f32[1,128], index: 2, kind: input, shape index: {}]   ;;  %s1209_s3 = inlined_call_operand.vmem [shape: f32[1,128], index: 3, kind: input, shape index: {}]   ;;  %s1210_s4 = inlined_call_operand.vmem [shape: f32[1,128], index: 4, kind: input, shape index: {}]   ;;  %s1211_s5 = inlined_call_operand.hbm [shape: bf16[128,128], index: 5, kind: input, shape index: {}]   ;;  %s1212_s6 = inlined_call_operand.hbm [shape: f32[8,128], index: 6, kind: output, shape index: {}]  }
   0x1   :  { %12 = vsyncpa [#allocation11], 0 }
   0x2   :  { %13 = vsyncpa [#allocation9], 0 }
   0x3   :  { %15 = vsyncpa [#allocation9 + $0x1], 0  ;;  %s1055_s21 = smov 0   ;;  %s1057_s22 = smov 0  }
   0x4   :  { %s1059_s23 = smov 0  }
   0x5 LB: > { %s713_s24 = sadd.s32 4294967295, %s1008_s23   ;;  %s714_s25 = sadd.s32 4294967294, %s1008_s23   ;;  %s1008_s23 = sphi %s1059_s23, %s21_s23   ;;  %s1004_s22 = sphi %s1057_s22, %s1223_s22   ;;  %s1000_s21 = sphi %s1055_s21, %s1222_s21  }
   0x6   : > { %s33_s26 = sadd.s32 1, %s1004_s22  ;;  %p715_p0 = scmp.ge.s32.totalorder %s1008_s23, 1 }
   0x7   : > { %p35_p1 = scmp.ge.s32.totalorder %s33_s26, 2  ;;  %p201_p2 = scmp.lt.s32.totalorder %s1008_s23, 3 }
   0x8   : > { %p1077_p3 = scmp.eq.s32.totalorder %s713_s24, 0  ;;  %s1010_s29 = smov [#allocation7]  }
   0x9   : > { %s1225_s26 = smov (%p35_p1, %s33_s26), 0  ;;  %p1083_p4 = pnand %p715_p0, %p201_p2 }
   0xa   : > { %s1216_s27 = scalar_select %p1077_p3, 1, 0 }
   0xb   : > { %s1217_s28 = scalar_select %p1083_p4, 1, 0 }
   0xc   : > { %s213_s30 = sshll.u32 %s1010_s29, 4  ;;  %p822_p5 = pneg %p1083_p4  ;;  %s214_s30 = int_to_ptr.vmem [resolvable:$true] %s213_s30 }
   0xd   : > { %s1011_s8 = smov [#allocation10]   ;;  %s892_s12 = scalar_lea.hbm %s1207_s1, 1024 }
   0xe   : > { %p1091_p6 = pnand %p1077_p3, %p822_p5  ;;  %s235_s9 = sshll.u32 %s1011_s8, 4  ;;  %s1095_s9 = int_to_ptr.vmem [resolvable:$true] %s235_s9 }
   0xf   : > { %p893_p7 = scmp.ne.s32.totalorder %s1207_s1, %s892_s12  ;;  %p899_p11 = scmp.lt.u32.totalorder %s892_s12, %s1207_s1 }
  0x10   : > { %p894_p8 = pneg %p1091_p6 }
  0x12   : > { %p895_p9 = pnand %p894_p8, %p893_p7 }
  0x14   : > { %p896_p10 = pneg %p895_p9 }
  0x16   : > { %p901_p12 = pnand %p899_p11, %p896_p10 }
  0x18   : > { %904 = shalt.err (!%p901_p12)
}
  0x19   : > { %s905_s17 = scalar_lea.vmem %s214_s30, 1024  ;;  %p913_p2 = scmp.lt.s32.totalorder %s214_s30, %s214_s30 }
  0x1a   : > { %p906_p13 = scmp.ne.s32.totalorder %s214_s30, %s905_s17  ;;  %p914_p5 = scmp.lt.s32.totalorder %s905_s17, %s905_s17 }
  0x1c   : > { %p908_p0 = pnand %p906_p13, %p894_p8  ;;  %p915_p3 = por %p914_p5, %p913_p2 }
  0x1e   : > { %p909_p1 = pneg %p908_p0 }
  0x20   : > { %p916_p4 = pnand %p915_p3, %p909_p1 }
  0x22   : > { %919 = shalt.err (!%p916_p4)
}
  0x23   : > { %s1012_s18 = smov 64   ;;  %s1013_s19 = smov 4  }
  0x24   : > { %825 = dma.hbm_to_vmem [thread:$0]  (!%p1091_p6), %s1207_s1, 1024, %s214_s30, [#allocation8], %s1012_s18, %s1012_s18, %s1013_s19  }
  0x25   : > { %s920_s11 = scalar_lea.hbm %s1211_s5, 1024 }
  0x26   : > { %p921_p7 = scmp.ne.s32.totalorder %s1211_s5, %s920_s11  ;;  %p927_p9 = scmp.lt.u32.totalorder %s920_s11, %s1211_s5 }
  0x28   : > { %p923_p3 = pnand %p921_p7, %p894_p8 }
  0x2a   : > { %p924_p4 = pneg %p923_p3 }
  0x2c   : > { %p929_p10 = pnand %p927_p9, %p924_p4 }
  0x2e   : > { %932 = shalt.err (!%p929_p10)
}
  0x2f   : > { %s933_s30 = scalar_lea.vmem %s1095_s9, 1024  ;;  %p941_p0 = scmp.lt.s32.totalorder %s1095_s9, %s1095_s9 }
  0x30   : > { %p934_p11 = scmp.ne.s32.totalorder %s1095_s9, %s933_s30  ;;  %p942_p1 = scmp.lt.s32.totalorder %s933_s30, %s933_s30 }
  0x32   : > { %p936_p12 = pnand %p934_p11, %p894_p8  ;;  %p943_p2 = por %p942_p1, %p941_p0 }
  0x34   : > { %p937_p13 = pneg %p936_p12 }
  0x36   : > { %p944_p5 = pnand %p943_p2, %p937_p13 }
  0x38   : > { %947 = shalt.err (!%p944_p5)
}
  0x39   : > { %828 = dma.hbm_to_vmem [thread:$0]  (!%p1091_p6), %s1211_s5, 1024, %s1095_s9, [#allocation11], %s1012_s18, %s1012_s18, %s1013_s19  }
  0x3a   : > { %p1219_p7 = scmp.ne.s32.totalorder %s1217_s28, 0 }
  0x3b   : > { %p1220_p3 = scmp.ne.s32.totalorder (!%p1219_p7), %s1216_s27, 0 }
  0x3c   : > { %262 = sbr.rel (%p1219_p7) target bundleno = 649 (0x289), region = 44 }
  0x43   : > { %987 = dma.done.wait (%p1220_p3), [#allocation8], 1024  }
  0x44   : > { %989 = vsyncadd (%p1220_p3), [#allocation8], 4294966272 }
  0x45   : > { %991 = dma.done.wait (%p1220_p3), [#allocation11], 1024  }
  0x46   : > { %993 = vsyncadd (%p1220_p3), [#allocation11], 4294966272  ;;  %p307_p8 = scmp.eq.s32.totalorder %s1000_s21, 0 }
  0x47   : > { %v1014_v0 = vmov (%p307_p8), 0.0  }
  0x48   : > { %312 = sbr.rel (!%p307_p8) target bundleno = 79 (0x4f), region = 56  ;;  %313 = vst [vmem:[#allocation3] sm:$0x1] (%p307_p8), %v1014_v0  ;;  %314 = vst [vmem:[#allocation4] sm:$0x1] (%p307_p8), %v1014_v0 }
  0x4f PF: > { %p724_p6 = scmp.ne.s32.totalorder %s1000_s21, 0 }
  0x50   : > { %v874_v1 = vld [vmem:[#allocation7] sm:$0xff] (!%p724_p6)   ;;  %v1015_v2 = vmov (!%p724_p6), 0.0   ;;  %v875_v3 = vld [vmem:[#allocation7 + $0x8] sm:$0xff] (!%p724_p6)   ;;  %vm1016_vm0 = vmmov (!%p724_p6), 0   ;;  %v876_v4 = vld [vmem:[#allocation7 + $0x10] sm:$0xff] (!%p724_p6)  }
  0x51   : > { %317 = sbr.rel (%p724_p6) target bundleno = 344 (0x158), region = 60  ;;  %770 = vmatprep.subr.bf16.mxu0 (!%p724_p6), %v1015_v2  ;;  %786 = vmatprep.mubr.msk.bf16.mxu0 (!%p724_p6), %vm1016_vm0, %v1015_v2  ;;  %v877_v5 = vld [vmem:[#allocation7 + $0x18] sm:$0xff] (!%p724_p6)   ;;  %v878_v6 = vld [vmem:[#allocation7 + $0x20] sm:$0xff] (!%p724_p6)   ;;  %v879_v7 = vld [vmem:[#allocation7 + $0x28] sm:$0xff] (!%p724_p6)  }
  0x52   : > { %771 = vmatpush3.bf16.msra.mxu0 (!%p724_p6), %v874_v1  ;;  %v880_v8 = vld [vmem:[#allocation7 + $0x30] sm:$0xff] (!%p724_p6)   ;;  %v881_v9 = vld [vmem:[#allocation7 + $0x38] sm:$0xff] (!%p724_p6)  }
  0x53   : > { %772 = vmatprep.subr.bf16.mxu0 (!%p724_p6), %v1015_v2  ;;  %v318_v10 = vld [vmem:[%s1206_s0] sm:$0xff] (!%p724_p6)  ;;  %v435_v29 = vld [vmem:[#allocation3] sm:$0x1] (!%p724_p6)  ;;  %v444_v32 = vld [vmem:[#allocation4] sm:$0x1] (!%p724_p6) }
  0x54   : > { %v319_v11 = vpack.c.bf16 (!%p724_p6), %v318_v10, %v318_v10  ;;  %v725_v12 = vld [vmem:[%s1208_s2] ss:$0 sm:$0xff] (!%p724_p6) }
  0x56   : > { %773 = vmatpush3.bf16.msra.mxu0 (!%p724_p6), %v875_v3 }
  0x57   : > { %774 = vmatprep.subr.bf16.mxu0 (!%p724_p6), %v1015_v2 }
  0x5a   : > { %775 = vmatpush3.bf16.msra.mxu0 %v876_v4 }
  0x5b   : > { %776 = vmatprep.subr.bf16.mxu0 %v1015_v2 }
  0x5e   : > { %777 = vmatpush3.bf16.msra.mxu0 %v877_v5 }
  0x5f   : > { %778 = vmatprep.subr.bf16.mxu0 %v1015_v2 }
  0x62   : > { %779 = vmatpush3.bf16.msra.mxu0 %v878_v6 }
  0x63   : > { %780 = vmatprep.subr.bf16.mxu0 %v1015_v2 }
  0x66   : > { %781 = vmatpush3.bf16.msra.mxu0 %v879_v7 }
  0x67   : > { %782 = vmatprep.subr.bf16.mxu0 %v1015_v2 }
  0x6a   : > { %783 = vmatpush3.bf16.msra.mxu0 %v880_v8 }
  0x6b   : > { %784 = vmatprep.subr.bf16.mxu0 %v1015_v2 }
  0x6e   : > { %785 = vmatpush3.bf16.msra.mxu0 %v881_v9 }
  0x71   : > { %787 = vmatmul.mubr.bf16.vlgmr.msra.gmra.mrb[0].mxu0 %v319_v11 }
 0x144   : > { %v425_v13 = vpop.f32.mrb[0].mxu0 }
 0x145   : > { %v426_v14 = vadd.f32 %v725_v12, %v425_v13  ;;  %v788_v15 = vpop.f32.mrb[1].mxu0 }
 0x146   : > { %v428_v16 = vpop.f32.mrb[2].mxu0 }
 0x147   : > { %v431_v17 = vpack.c.bf16 %v426_v14, %v426_v14  ;;  %v436_v18 = vrot.slane %v426_v14, 4  ;;  %v445_v19 = vmul.f32 %v426_v14, %v426_v14  ;;  %v789_v20 = vpop.f32.mrb[3].mxu0 }
 0x149   : > { %434 = vst [vmem:[#allocation2] sm:$0xf] %v431_v17  ;;  %v437_v21 = vadd.f32 %v436_v18, %v426_v14  ;;  %v446_v22 = vrot.slane %v445_v19, 4 }
 0x14b   : > { %v438_v23 = vrot.slane %v437_v21, 2  ;;  %v447_v24 = vadd.f32 %v446_v22, %v445_v19 }
 0x14d   : > { %v439_v25 = vadd.f32 %v438_v23, %v437_v21  ;;  %v448_v26 = vrot.slane %v447_v24, 2 }
 0x14f   : > { %v440_v27 = vrot.slane %v439_v25, 1  ;;  %v449_v28 = vadd.f32 %v448_v26, %v447_v24 }
 0x151   : > { %v441_v30 = vadd.f32 %v440_v27, %v439_v25  ;;  %v450_v31 = vrot.slane %v449_v28, 1 }
 0x153   : > { %v442_v33 = vadd.f32 %v441_v30, %v435_v29  ;;  %v451_v34 = vadd.f32 %v450_v31, %v449_v28 }
 0x155   : > { %443 = vst [vmem:[#allocation3] sm:$0x1] %v442_v33  ;;  %v452_v35 = vadd.f32 %v451_v34, %v444_v32 }
 0x157   : > { %453 = vst [vmem:[#allocation4] sm:$0x1] %v452_v35 }
 0x158 PF: > { %p454_p4 = scmp.eq.s32.totalorder %s1000_s21, 1 }
 0x159   : > { %v466_v44 = vld [vmem:[%s1209_s3] sm:$0x1] (%p454_p4) }
 0x15a   : > { %458 = sbr.rel (!%p454_p4) target bundleno = 377 (0x179), region = 64  ;;  %v471_v47 = vld [vmem:[%s1210_s4] sm:$0x1] (%p454_p4) }
 0x15c   : > { %v459_v36 = vld [vmem:[#allocation3] sm:$0x1] (%p454_p4) }
 0x15d   : > { %v460_v38 = vmul.f32 (%p454_p4), 0.125, %v459_v36 }
 0x15e   : > { %v461_v37 = vld [vmem:[#allocation4] sm:$0x1] (%p454_p4) }
 0x15f   : > { %v462_v39 = vmul.f32 (%p454_p4), 0.125, %v461_v37  ;;  %v463_v40 = vmul.f32 (%p454_p4), %v460_v38, %v460_v38 }
 0x161   : > { %v464_v41 = vsub.f32 %v462_v39, %v463_v40 }
 0x163   : > { %v465_v42 = vmax.f32 %v464_v41, 0.0 }
 0x165   : > { %v467_v43 = vadd.f32 1e-05, %v465_v42 }
 0x167   : > { %882 = vrsqrt.f32 %v467_v43 }
 0x171   : > { %v883_v45 = vpop.eup %882 }
 0x172   : > { %v469_v46 = vmul.f32 %v883_v45, %v466_v44 }
 0x174   : > { %470 = vst [vmem:[#allocation5] sm:$0x1] %v469_v46  ;;  %v472_v48 = vmul.f32 %v469_v46, %v460_v38 }
 0x176   : > { %v473_v49 = vsub.f32 %v471_v47, %v472_v48 }
 0x178   : > { %474 = vst [vmem:[#allocation6] sm:$0x1] %v473_v49 }
 0x179 PF: > { %p735_p9 = scmp.ne.s32.totalorder %s1000_s21, 1 }
 0x17a   : > { %v884_v50 = vld [vmem:[#allocation10] sm:$0xff] (!%p735_p9)   ;;  %v1017_v51 = vmov (!%p735_p9), 0.0   ;;  %v885_v52 = vld [vmem:[#allocation10 + $0x8] sm:$0xff] (!%p735_p9)   ;;  %vm1018_vm1 = vmmov (!%p735_p9), 0   ;;  %v886_v53 = vld [vmem:[#allocation10 + $0x10] sm:$0xff] (!%p735_p9)  }
 0x17b   : > { %477 = sbr.rel (%p735_p9) target bundleno = 626 (0x272), region = 68  ;;  %790 = vmatprep.subr.bf16.mxu0 (!%p735_p9), %v1017_v51  ;;  %806 = vmatprep.mubr.msk.bf16.mxu0 (!%p735_p9), %vm1018_vm1, %v1017_v51  ;;  %v887_v54 = vld [vmem:[#allocation10 + $0x18] sm:$0xff] (!%p735_p9)   ;;  %v888_v57 = vld [vmem:[#allocation10 + $0x20] sm:$0xff] (!%p735_p9)   ;;  %v889_v60 = vld [vmem:[#allocation10 + $0x28] sm:$0xff] (!%p735_p9)  }
 0x17c   : > { %791 = vmatpush3.bf16.msra.mxu0 (!%p735_p9), %v884_v50  ;;  %v480_v55 = vld [vmem:[#allocation2] sm:$0xf] (!%p735_p9)  ;;  %v736_v58 = vld [vmem:[#allocation5] ss:$0 sm:$0xff] (!%p735_p9)  ;;  %v890_v63 = vld [vmem:[#allocation10 + $0x30] sm:$0xff] (!%p735_p9)  }
 0x17d   : > { %792 = vmatprep.subr.bf16.mxu0 (!%p735_p9), %v1017_v51  ;;  %v481_v56 = vunpack.c.l.bf16 (!%p735_p9), %v480_v55  ;;  %v891_v1 = vld [vmem:[#allocation10 + $0x38] sm:$0xff] (!%p735_p9)  }
 0x17f   : > { %v489_v59 = vmul.f32 (!%p735_p9), %v736_v58, %v481_v56  ;;  %v737_v61 = vld [vmem:[#allocation6] ss:$0 sm:$0xff] (!%p735_p9) }
 0x180   : > { %793 = vmatpush3.bf16.msra.mxu0 (!%p735_p9), %v885_v52 }
 0x181   : > { %794 = vmatprep.subr.bf16.mxu0 (!%p735_p9), %v1017_v51  ;;  %v497_v62 = vadd.f32 (!%p735_p9), %v737_v61, %v489_v59 }
 0x183   : > { %v498_v0 = vmax.f32 %v497_v62, 0.0 }
 0x184   : > { %795 = vmatpush3.bf16.msra.mxu0 %v886_v53 }
 0x185   : > { %796 = vmatprep.subr.bf16.mxu0 %v1017_v51  ;;  %v499_v2 = vpack.c.bf16 %v498_v0, %v498_v0 }
 0x188   : > { %797 = vmatpush3.bf16.msra.mxu0 %v887_v54 }
 0x189   : > { %798 = vmatprep.subr.bf16.mxu0 %v1017_v51 }
 0x18c   : > { %799 = vmatpush3.bf16.msra.mxu0 %v888_v57 }
 0x18d   : > { %800 = vmatprep.subr.bf16.mxu0 %v1017_v51 }
 0x190   : > { %801 = vmatpush3.bf16.msra.mxu0 %v889_v60 }
 0x191   : > { %802 = vmatprep.subr.bf16.mxu0 %v1017_v51 }
 0x194   : > { %803 = vmatpush3.bf16.msra.mxu0 %v890_v63 }
 0x195   : > { %804 = vmatprep.subr.bf16.mxu0 %v1017_v51 }
 0x198   : > { %805 = vmatpush3.bf16.msra.mxu0 %v891_v1 }
 0x19b   : > { %807 = vmatmul.mubr.bf16.vlgmr.msra.gmra.mrb[0].mxu0 %v499_v2 }
 0x26e   : > { %v598_v3 = vpop.f32.mrb[0].mxu0 }
 0x26f   : > { %604 = vst [vmem:[#allocation12] sm:$0xff] %v598_v3  ;;  %v808_v4 = vpop.f32.mrb[1].mxu0 }
 0x270   : > { %v601_v5 = vpop.f32.mrb[2].mxu0 }
 0x271   : > { %v809_v6 = vpop.f32.mrb[3].mxu0 }
 0x272 PF: > { %p1172_p10 = scmp.eq.s32.totalorder %s713_s24, 1  ;;  %s1019_s8 = smov [#allocation12]  }
 0x273   : > { %s620_s10 = sshll.u32 %s1019_s8, 4  ;;  %s621_s10 = int_to_ptr.vmem [resolvable:$true] %s620_s10 }
 0x274   : > { %s948_s11 = scalar_lea.vmem %s621_s10, 128  ;;  %s954_s12 = scalar_lea.vmem %s621_s10, 256 }
 0x275   : > { %p949_p11 = scmp.ne.s32.totalorder %s621_s10, %s948_s11  ;;  %p955_p0 = scmp.lt.s32.totalorder %s621_s10, %s621_s10 }
 0x276   : > { %p956_p1 = scmp.lt.s32.totalorder %s954_s12, %s948_s11 }
 0x277   : > { %p950_p12 = pnand %p949_p11, %p1172_p10 }
 0x278   : > { %p957_p2 = por %p956_p1, %p955_p0 }
 0x279   : > { %p951_p13 = pneg %p950_p12 }
 0x27b   : > { %p958_p5 = pnand %p957_p2, %p951_p13 }
 0x27d   : > { %961 = shalt.err (!%p958_p5)
}
 0x27e   : > { %s962_s14 = scalar_lea.hbm %s1212_s6, 128 }
 0x27f   : > { %p963_p7 = scmp.ne.s32.totalorder %s1212_s6, %s962_s14  ;;  %p968_p6 = scmp.lt.u32.totalorder %s962_s14, %s1212_s6 }
 0x281   : > { %p964_p3 = pnand %p963_p7, %p1172_p10 }
 0x283   : > { %p965_p8 = pneg %p964_p3 }
 0x285   : > { %p970_p4 = pnand %p968_p6, %p965_p8 }
 0x287   : > { %973 = shalt.err (!%p970_p4)
}
 0x288   : > { %819 = dma.vmem_to_hbm [thread:$0]  (%p1172_p10), %s621_s10, 128, %s1212_s6, [#allocation9]  }
 0x289 PF: > { %p838_p9 = scmp.ge.s32.totalorder %s1008_s23, 2  ;;  %p839_p11 = scmp.eq.s32.totalorder %s714_s25, 1 }
 0x28b   : > { %p830_p12 = pnand %p839_p11, %p838_p9 }
 0x28d   : > { %995 = dma.done.wait (!%p830_p12), [#allocation9], 128  }
 0x28e   : > { %997 = vsyncadd (!%p830_p12), [#allocation9], 4294967168  ;;  %s21_s23 = sadd.s32 1, %s1008_s23   ;;  %s1222_s21 = smov %s1004_s22 }
 0x28f   : > { %p18_p13 = scmp.ge.s32.totalorder %s21_s23, 4   ;;  %s1223_s22 = smov %s1225_s26 }
 0x291   :  { %20 = sbr.rel (!%p18_p13) target bundleno = 5 (0x5), region = 106 }
 0x298   :  { %638 = vsyncpa [#allocation8], 1 }
 0x299   :  { %640 = vsyncpa [#allocation8 + $0x1], 1 }
 0x29a   :  { %641 = vsyncpa [#allocation11], 1 }
 0x29b   :  { %642 = vsyncpa [#allocation9], 1 }
 0x29c   :  { %644 = vsyncpa [#allocation9 + $0x1], 1 }

</bundles_post_ra>
